<compile_context>
chip_gen: v6e
topology: v6e:2x2x1
jax: 0.10.0
libtpu: 0.0.40
codegen_flags: <defaults>
</compile_context>

<pallas_src>
from typing import NamedTuple

import jax
import jax.numpy as jnp
from jax.experimental import pallas as pl
from jax.experimental.pallas import tpu as pltpu

LANE = 128     # vreg lane width
SUBLANE = 8    # f32 sublane count


def _round_up(a: int, b: int) -> int:
    return -(-a // b) * b


class LinearParams(NamedTuple):
    w_packed: jax.Array   # (pack * in_features, out_lane)  block-diagonal weight
    b_packed: jax.Array   # (1, out_lane)                   tiled padded bias
    in_features: int
    out_features: int
    pack: int             # batch rows packed per 128-lane output row
    out_sub: int           # per-row padded feature width (out_lane // pack)


def prepare_linear_params(weight: jax.Array, bias: jax.Array) -> LinearParams:
    """Init-time packing of torch-layout (out, in) weight + (out,) bias.

    Done ONCE per parameter set (not per forward call)."""
    out_features, in_features = weight.shape
    out_sub = _round_up(out_features, SUBLANE)
    if LANE % out_sub == 0:
        pack = LANE // out_sub                      # e.g. 5 -> out_sub=8, pack=16
    else:
        pack = 1                                    # fallback: plain lane-dense pad
        out_sub = _round_up(out_features, LANE)
    out_lane = pack * out_sub                       # multiple of 128

    w_pad = jnp.pad(weight, ((0, out_sub - out_features), (0, 0)))       # (out_sub, IN)
    # Block-diagonal packed weight: y_packed = x_packed @ w_packed + b_packed
    w_packed = jnp.kron(jnp.eye(pack, dtype=weight.dtype), w_pad.T)      # (pack*IN, out_lane)
    b_packed = jnp.tile(
        jnp.pad(bias, (0, out_sub - out_features)), pack).reshape(1, out_lane)
    return LinearParams(w_packed, b_packed, in_features, out_features, pack, out_sub)


def _linear_kernel(x_ref, w_ref, b_ref, o_ref):
    # x_ref: (tp, pack*IN)   in VMEM (tp packed rows = tp*pack batch rows)
    # w_ref: (pack*IN, out_lane) resident across the grid
    # b_ref: (1, out_lane)       resident across the grid
    # o_ref: (tp, out_lane)      lane-dense, unmasked stores
    acc = jnp.dot(x_ref[...], w_ref[...], preferred_element_type=jnp.float32)
    o_ref[...] = (acc + b_ref[...]).astype(o_ref.dtype)


def custom_linear(x: jax.Array, params: LinearParams) -> jax.Array:
    """y = x @ weight.T + bias (torch.nn.Linear semantics)."""
    B, in_features = x.shape
    assert in_features == params.in_features
    pack = params.pack
    out_lane = params.w_packed.shape[1]

    # Pack `pack` batch rows per output lane-row.  The reshape is a free
    # row-major merge; only a ragged tail (B % pack != 0) triggers a small pad.
    b_pad = _round_up(B, pack)
    if b_pad != B:
        x = jnp.pad(x, ((0, b_pad - B), (0, 0)))
    n_packed = b_pad // pack
    x_packed = x.reshape(n_packed, pack * in_features)

    # Tile over packed rows: large tiles (cap ~4096 batch rows) to amortize the
    # per-step overhead, but prefer >=2 grid steps so both v7x TCs get work.
    cap_tp = max(SUBLANE, 4096 // pack)
    if n_packed <= SUBLANE or n_packed % SUBLANE != 0:
        tp = n_packed                                # single full-extent block
    else:
        tp = SUBLANE
        while (tp * 2 <= cap_tp
               and n_packed % (tp * 2) == 0
               and n_packed // (tp * 2) >= 2):
            tp *= 2
    grid = (n_packed // tp,)

    y_packed = pl.pallas_call(
        _linear_kernel,
        out_shape=jax.ShapeDtypeStruct((n_packed, out_lane), x.dtype),
        grid_spec=pltpu.PrefetchScalarGridSpec(
            num_scalar_prefetch=0,
            grid=grid,
            in_specs=[
                # x: tiled along (packed) batch, pipelined against compute.
                pl.BlockSpec((tp, pack * in_features), lambda i: (i, 0)),
                # weight / bias: full-extent blocks, resident across the grid.
                pl.BlockSpec(params.w_packed.shape, lambda i: (0, 0)),
                pl.BlockSpec(params.b_packed.shape, lambda i: (0, 0)),
            ],
            out_specs=pl.BlockSpec((tp, out_lane), lambda i: (i, 0)),
        ),
        compiler_params=pltpu.CompilerParams(
            # Independent across grid steps -> shardable on v7x's 2 TCs
            # (no-op on single-TC v5e/v6e).
            dimension_semantics=("parallel",),
        ),
    )(x_packed, params.w_packed, params.b_packed)

    # Unpack: free row-major reshape + small slice of the real columns.
    return y_packed.reshape(b_pad, params.out_sub)[:B, :params.out_features]


if __name__ == "__main__":
    key = jax.random.PRNGKey(0)
    k_x, k_w, k_b = jax.random.split(key, 3)

    in_features, out_features, batch = 10, 5, 16

    # Deterministic parameter init mimicking torch.nn.Linear default:
    # uniform(-1/sqrt(in_features), 1/sqrt(in_features))
    bound = 1.0 / jnp.sqrt(jnp.float32(in_features))
    weight = jax.random.uniform(
        k_w, (out_features, in_features), jnp.float32, -bound, bound)
    bias = jax.random.uniform(
        k_b, (out_features,), jnp.float32, -bound, bound)

    x = jax.random.normal(k_x, (batch, in_features), jnp.float32)

    # Init-time (once): pack weight/bias.  Per-call: only the kernel + free
    # reshapes + a tiny slice.
    params = prepare_linear_params(weight, bias)

    y = custom_linear(x, params)
    y = jax.block_until_ready(y)

    # Correctness check against pure-JAX reference.
    y_ref = x @ weight.T + bias
    assert y.shape == (batch, out_features)
    assert jnp.allclose(y, y_ref, atol=1e-5, rtol=1e-5)

    print("KERNEL_OK")
</pallas_src>

<mosaic_0001>
module attributes {stable_mosaic.version = 11 : i64} {
  func.func @_linear_kernel(%arg0: i32, %arg1: memref<1x160xf32, #tpu.memory_space<vmem>>, %arg2: memref<160x128xf32, #tpu.memory_space<vmem>>, %arg3: memref<1x128xf32, #tpu.memory_space<vmem>>, %arg4: memref<1x128xf32, #tpu.memory_space<vmem>>) attributes {dimension_semantics = [#tpu.dimension_semantics<parallel>], iteration_bounds = array<i64: 1>, scalar_prefetch = 0 : i64, scratch_operands = 0 : i64, tpu.core_type = #tpu.core_type<tc>, window_params = [{transform_indices = @transform_0, window_bounds = array<i64: 1, 160>}, {pipeline_mode = #tpu.pipeline_mode<synchronous>, transform_indices = @transform_1, window_bounds = array<i64: 160, 128>}, {pipeline_mode = #tpu.pipeline_mode<synchronous>, transform_indices = @transform_2, window_bounds = array<i64: 1, 128>}, {transform_indices = @transform_3, window_bounds = array<i64: 1, 128>}]} {
    %c0 = arith.constant 0 : index
    %c0_0 = arith.constant 0 : index
    %0 = vector.load %arg1[%c0, %c0_0] : memref<1x160xf32, #tpu.memory_space<vmem>>, vector<1x160xf32>
    %c0_1 = arith.constant 0 : index
    %c0_2 = arith.constant 0 : index
    %1 = vector.load %arg2[%c0_1, %c0_2] : memref<160x128xf32, #tpu.memory_space<vmem>>, vector<160x128xf32>
    %cst = arith.constant dense<0.000000e+00> : vector<1x128xf32>
    %2 = tpu.matmul %0, %1, %cst {dimension_numbers = #tpu.dot_dimension_numbers<[1], [0], [0], [1], [0, 0, 1, 1], [], []>} : vector<1x160xf32>, vector<160x128xf32>, vector<1x128xf32> -> vector<1x128xf32>
    %c0_3 = arith.constant 0 : index
    %c0_4 = arith.constant 0 : index
    %3 = vector.load %arg3[%c0_3, %c0_4] : memref<1x128xf32, #tpu.memory_space<vmem>>, vector<1x128xf32>
    %4 = arith.addf %2, %3 : vector<1x128xf32>
    %c0_5 = arith.constant 0 : index
    %c0_6 = arith.constant 0 : index
    %5 = vector.load %arg4[%c0_5, %c0_6] : memref<1x128xf32, #tpu.memory_space<vmem>>, vector<1x128xf32>
    tpu.vector_store %arg4[%c0_5, %c0_6], %4 {strides = array<i32>} : memref<1x128xf32, #tpu.memory_space<vmem>>, vector<1x128xf32>,
    return
  }
  func.func @transform_0(%arg0: i32) -> (i32, i32) {
    %c0_i32 = arith.constant 0 : i32
    %c0_i32_0 = arith.constant 0 : i32
    return %arg0, %c0_i32 : i32, i32
  }
  func.func @transform_1(%arg0: i32) -> (i32, i32) {
    %c0_i32 = arith.constant 0 : i32
    %c0_i32_0 = arith.constant 0 : i32
    %c0_i32_1 = arith.constant 0 : i32
    return %c0_i32, %c0_i32_0 : i32, i32
  }
  func.func @transform_2(%arg0: i32) -> (i32, i32) {
    %c0_i32 = arith.constant 0 : i32
    %c0_i32_0 = arith.constant 0 : i32
    %c0_i32_1 = arith.constant 0 : i32
    return %c0_i32, %c0_i32_0 : i32, i32
  }
  func.func @transform_3(%arg0: i32) -> (i32, i32) {
    %c0_i32 = arith.constant 0 : i32
    %c0_i32_0 = arith.constant 0 : i32
    return %arg0, %c0_i32 : i32, i32
  }
}

</mosaic_0001>

<bundles_post_ra>
// kernel: tpu_custom_call.1
= control target key start
LH: loop header
LB: loop body
LE: loop exit
PB: predicated region body
PF: predicated region fallthrough
CT: control target
= control target key end

     0   :  { %8 = vsyncpa [#allocation3], 0  ;;  %s298_s0 = inlined_call_operand.hbm [shape: f32[1,160], index: 0, kind: input, shape index: {}]   ;;  %s299_s1 = inlined_call_operand.hbm [shape: f32[160,128], index: 1, kind: input, shape index: {}]   ;;  %s300_s2 = inlined_call_operand.vmem [shape: f32[1,128], index: 2, kind: input, shape index: {}]   ;;  %s301_s3 = inlined_call_operand.hbm [shape: f32[1,128], index: 3, kind: output, shape index: {}]  }
   0x1   :  { %9 = vsyncpa [#allocation6], 0 }
   0x2   :  { %10 = vsyncpa [#allocation4], 0  ;;  %s236_s12 = smov [#allocation2]   ;;  %s237_s14 = smov [#allocation5]  }
   0x3   :  { %s17_s13 = sshll.u32 %s236_s12, 4  ;;  %s26_s15 = sshll.u32 %s237_s14, 4  ;;  %s18_s13 = int_to_ptr.vmem [resolvable:$true] %s17_s13  ;;  %s27_s15 = int_to_ptr.vmem [resolvable:$true] %s26_s15 }
   0x4   :  { %s178_s16 = scalar_lea.vmem %s18_s13, 32  ;;  %p183_p1 = scmp.lt.s32.totalorder %s18_s13, %s18_s13 }
   0x5   :  { %p179_p0 = scmp.ne.s32.totalorder %s18_s13, %s178_s16  ;;  %p184_p2 = scmp.lt.s32.totalorder %s178_s16, %s178_s16 }
   0x7   :  { %p185_p3 = por %p184_p2, %p183_p1 }
   0x9   :  { %p186_p4 = pnand %p185_p3, %p179_p0 }
   0xb   :  { %189 = shalt.err (!%p186_p4)
}
   0xc   :  { %20 = dma.hbm_to_vmem [thread:$0]  %s298_s0, 32, %s18_s13, [#allocation3]  }
   0xd   :  { %s198_s19 = scalar_lea.vmem %s27_s15, 2560  ;;  %p203_p6 = scmp.lt.s32.totalorder %s27_s15, %s27_s15 }
   0xe   :  { %p199_p5 = scmp.ne.s32.totalorder %s27_s15, %s198_s19  ;;  %p204_p7 = scmp.lt.s32.totalorder %s198_s19, %s198_s19 }
  0x10   :  { %p205_p8 = por %p204_p7, %p203_p6 }
  0x12   :  { %p206_p9 = pnand %p205_p8, %p199_p5 }
  0x14   :  { %209 = shalt.err (!%p206_p9)
}
  0x15   :  { %s238_s20 = smov 128   ;;  %s239_s21 = smov 8  }
  0x16   :  { %32 = dma.hbm_to_vmem [thread:$0]  %s299_s1, 2560, %s27_s15, [#allocation6], %s238_s20, %s238_s20, %s239_s21  }
  0x17   :  { %230 = dma.done.wait [#allocation3], 32  }
  0x18   :  { %231 = vsyncadd [#allocation3], 4294967264 }
  0x19   :  { %232 = dma.done.wait [#allocation6], 2560  }
  0x1a   :  { %233 = vsyncadd [#allocation6], 4294964736  ;;  %v240_v0 = vmov 0.0   ;;  %v64_v1 = vlaneseq  ;;  %v57_v3 = vld [vmem:[#allocation5 + $0x78] sm:$0xff]  ;;  %v56_v4 = vld [vmem:[#allocation5 + $0x70] sm:$0xff]  ;;  %vm73_vm0 = vcmask 261120  }
  0x1b   :  { %76 = vmatprep.subr.mxu0 %v240_v0  ;;  %v55_v5 = vld [vmem:[#allocation5 + $0x68] sm:$0xff]  ;;  %v54_v7 = vld [vmem:[#allocation5 + $0x60] sm:$0xff]  ;;  %v53_v8 = vld [vmem:[#allocation5 + $0x58] sm:$0xff]  ;;  %s241_s24 = smov [#allocation7]  }
  0x1c   :  { %v269_v2 = vshrl.u32 %v64_v1, 7  ;;  %77 = vmatpush1.msra.mxu0 %v57_v3  ;;  %v41_v9 = vld [vmem:[#allocation2] sm:$0x3]  ;;  %v52_v11 = vld [vmem:[#allocation5 + $0x50] sm:$0xff]  ;;  %v51_v12 = vld [vmem:[#allocation5 + $0x48] sm:$0xff]  ;;  %s153_s25 = sshll.u32 %s241_s24, 4  ;;  %s154_s25 = int_to_ptr.vmem [resolvable:$true] %s153_s25 }
  0x1d   :  { %78 = vmatprep.subr.mxu0 %v240_v0  ;;  %v50_v13 = vld [vmem:[#allocation5 + $0x40] sm:$0xff]  ;;  %v49_v14 = vld [vmem:[#allocation5 + $0x38] sm:$0xff]  ;;  %v48_v15 = vld [vmem:[#allocation5 + $0x30] sm:$0xff]  ;;  %s210_s26 = scalar_lea.vmem %s154_s25, 16  ;;  %s214_s27 = scalar_lea.vmem %s154_s25, 32 }
  0x1e   :  { %79 = vmatpush1.msra.mxu0 %v56_v4  ;;  %v70_v6 = vsub.s32 1, %v269_v2  ;;  %v47_v16 = vld [vmem:[#allocation5 + $0x28] sm:$0xff]  ;;  %v46_v17 = vld [vmem:[#allocation5 + $0x20] sm:$0xff]  ;;  %v45_v18 = vld [vmem:[#allocation5 + $0x18] sm:$0xff]  ;;  %v66_v24 = vsub.s32 0, %v269_v2  ;;  %p211_p10 = scmp.ne.s32.totalorder %s154_s25, %s210_s26  ;;  %p215_p11 = scmp.lt.s32.totalorder %s154_s25, %s154_s25 }
  0x1f   :  { %80 = vmatprep.subr.mxu0 %v240_v0  ;;  %v44_v19 = vld [vmem:[#allocation5 + $0x10] sm:$0xff]  ;;  %v43_v20 = vld [vmem:[#allocation5 + $0x8] sm:$0xff]  ;;  %v42_v21 = vld [vmem:[#allocation5] sm:$0xff]  ;;  %p216_p12 = scmp.lt.s32.totalorder %s214_s27, %s210_s26 }
  0x20   :  { %81 = vmatpush1.msra.mxu0 %v55_v5  ;;  %v71_v10 = vrot.slane %v41_v9, %v70_v6  ;;  %v61_v22 = vld [vmem:[#allocation5 + $0x98] sm:$0xff]  ;;  %v60_v23 = vld [vmem:[#allocation5 + $0x90] sm:$0xff]  ;;  %v59_v25 = vld [vmem:[#allocation5 + $0x88] sm:$0xff]  ;;  %v67_v27 = vrot.slane %v41_v9, %v66_v24 }
  0x21   :  { %82 = vmatprep.subr.mxu0 %v240_v0  ;;  %v58_v26 = vld [vmem:[#allocation5 + $0x80] sm:$0xff]  ;;  %v62_v28 = vld [vmem:[%s300_s2] sm:$0x1]  ;;  %p217_p13 = por %p216_p12, %p215_p11 }
  0x22   :  { %83 = vmatpush1.msra.mxu0 %v54_v7  ;;  %163 = vmatprep.mubr.msk.f32.mxu0 %vm73_vm0, %v71_v10 }
  0x23   :  { %84 = vmatprep.subr.mxu0 %v240_v0  ;;  %p218_p0 = pnand %p217_p13, %p211_p10 }
  0x24   :  { %85 = vmatpush1.msra.mxu0 %v53_v8 }
  0x25   :  { %86 = vmatprep.subr.mxu0 %v240_v0 }
  0x26   :  { %87 = vmatpush1.msra.mxu0 %v52_v11 }
  0x27   :  { %88 = vmatprep.subr.mxu0 %v240_v0 }
  0x28   :  { %89 = vmatpush1.msra.mxu0 %v51_v12 }
  0x29   :  { %90 = vmatprep.subr.mxu0 %v240_v0 }
  0x2a   :  { %91 = vmatpush1.msra.mxu0 %v50_v13 }
  0x2b   :  { %92 = vmatprep.subr.mxu0 %v240_v0 }
  0x2c   :  { %93 = vmatpush1.msra.mxu0 %v49_v14 }
  0x2d   :  { %94 = vmatprep.subr.mxu0 %v240_v0 }
  0x2e   :  { %95 = vmatpush1.msra.mxu0 %v48_v15 }
  0x2f   :  { %96 = vmatprep.subr.mxu0 %v240_v0 }
  0x30   :  { %97 = vmatpush1.msra.mxu0 %v47_v16 }
  0x31   :  { %98 = vmatprep.subr.mxu0 %v240_v0 }
  0x32   :  { %99 = vmatpush1.msra.mxu0 %v46_v17 }
  0x33   :  { %100 = vmatprep.subr.mxu0 %v240_v0 }
  0x34   :  { %101 = vmatpush1.msra.mxu0 %v45_v18 }
  0x35   :  { %102 = vmatprep.subr.mxu0 %v240_v0 }
  0x36   :  { %103 = vmatpush1.msra.mxu0 %v44_v19 }
  0x37   :  { %104 = vmatprep.subr.mxu0 %v240_v0 }
  0x38   :  { %105 = vmatpush1.msra.mxu0 %v43_v20 }
  0x39   :  { %106 = vmatprep.subr.mxu0 %v240_v0 }
  0x3a   :  { %107 = vmatpush1.msra.mxu0 %v42_v21 }
  0x3b   :  { %132 = vmatprep.subr.mxu0 %v240_v0 }
  0x3c   :  { %133 = vmatpush2.msra.mxu0 %v61_v22 }
  0x3d   :  { %134 = vmatprep.subr.mxu0 %v240_v0 }
  0x3e   :  { %135 = vmatpush2.msra.mxu0 %v60_v23 }
  0x3f   :  { %136 = vmatprep.subr.mxu0 %v240_v0 }
  0x40   :  { %137 = vmatpush2.msra.mxu0 %v59_v25 }
  0x41   :  { %138 = vmatprep.subr.mxu0 %v240_v0 }
  0x42   :  { %139 = vmatpush2.msra.mxu0 %v58_v26 }
  0x43   :  { %141 = vmatmul.mubr.f32.vlgmr.msra.gmra.mxu0 %v67_v27 }
 0x103   :  { %v142_v29 = vpop.f32.mrf.mxu0 }
 0x104   :  { %v143_v30 = vadd.f32 %v142_v29, %v62_v28 }
 0x105   :  { %v144_v31 = vpop.f32.mrf.mxu0 }
 0x106   :  { %146 = vst [vmem:[#allocation7] sm:$0x1] %v143_v30 }
 0x107   :  { %221 = shalt.err (!%p218_p0)
}
 0x108   :  { %156 = dma.vmem_to_hbm [thread:$0]  %s154_s25, 16, %s301_s3, [#allocation4]  }
 0x109   :  { %234 = dma.done.wait [#allocation4], 16  }
 0x10a   :  { %235 = vsyncadd [#allocation4], 4294967280 }
 0x10b   :  { %160 = vsyncpa [#allocation3], 1 }
 0x10c   :  { %161 = vsyncpa [#allocation6], 1 }
 0x10d   :  { %162 = vsyncpa [#allocation4], 1 }

</bundles_post_ra>
